<compile_context>
chip_gen: v7x
topology: tpu7x:2x2x1
jax: 0.10.0
libtpu: 0.0.40
codegen_flags: <defaults>
</compile_context>

<pallas_src>
import functools

import numpy as np
import jax
import jax.numpy as jnp
from jax import lax
from jax.experimental import pallas as pl
from jax.experimental.pallas import tpu as pltpu

NEG_BIG = -100000.0

_VMEM_TILE_BUDGET = 24 * 1024 * 1024   # stay well under v7x 64 MiB physical / 32 MiB scoped
_VMEM_LIMIT_BYTES = 32 * 1024 * 1024   # explicit (v5e scoped default is only 16 MiB)
_MAX_TILE_ROWS = 4096
_K_CHUNK = 512                         # one-hot contraction chunk (multiple of 8)


def _round_up(x, m):
    return ((x + m - 1) // m) * m


# ----------------------------------------------------------------------------
# Kernel: out[r, :] = fused_table[ids[r], :] + priors[r, :]  per row tile.
# ----------------------------------------------------------------------------
def _cond_prob_kernel(ids_ref,     # VMEM int32 [TM, 1]     conditional index per row
                      table_ref,   # VMEM f32   [Kpad, R]   fused (uncond+cond) table + sentinel
                      prior_ref,   # VMEM f32   [TM, R]     full_logit_priors rows
                      out_ref,     # VMEM f32   [TM, R]     masked policy logits (out)
                      *, k_chunk):
    ids = ids_ref[...]                                   # (TM, 1)
    tm = ids.shape[0]
    k = table_ref.shape[0]
    acc = prior_ref[...]                                 # start from priors (f32, VPU add)
    # One-hot row gather on the MXU, chunked along the contraction dim so the
    # one-hot intermediate stays bounded even for large conditional counts.
    for k0 in range(0, k, k_chunk):
        kc = min(k_chunk, k - k0)
        one_hot = (ids == (lax.broadcasted_iota(jnp.int32, (tm, kc), 1) + k0)
                   ).astype(jnp.float32)
        # HIGHEST precision: the table rows (incl. the -1e5 sentinel) must
        # survive the MXU without bf16 rounding; extra passes are free here
        # (kernel is HBM-bandwidth bound, MXU slot is otherwise idle).
        acc = acc + jnp.dot(one_hot, table_ref[pl.ds(k0, kc), :],
                            preferred_element_type=jnp.float32,
                            precision=lax.Precision.HIGHEST)
    out_ref[...] = acc


# ----------------------------------------------------------------------------
# Parameter-only prep: hoisted out of the per-call path (cache per param update).
# ----------------------------------------------------------------------------
def prepare_fused_table(unconditionals, conditionals):
    """Fused table: row c = unconditionals + conditionals[c]; row C = NEG_BIG
    sentinel for 'no condition' nodes; sublane-padded to a multiple of 8.
    For best store bandwidth, pad num_rules (R) to a multiple of 128 upstream.
    Returns (table [Kpad, R], sentinel_index=C)."""
    C, R = conditionals.shape
    table = (conditionals.astype(jnp.float32)
             + unconditionals.astype(jnp.float32)[None, :])
    table = jnp.concatenate(
        [table, jnp.full((1, R), NEG_BIG, dtype=jnp.float32)], axis=0)   # (C+1, R)
    k = C + 1
    k_pad = _round_up(k, 8)
    if k_pad != k:
        table = jnp.concatenate(
            [table, jnp.zeros((k_pad - k, R), dtype=jnp.float32)], axis=0)  # never selected
    # TODO(synk): if (C+1)*R*4 ever approaches the VMEM budget (huge grammars),
    # K-tile the table over a second grid axis instead of keeping it resident.
    return table, C


def _derive_tile_rows(bn, r, k_pad, k_chunk, tile_rows):
    """Pick the row-tile size from the VMEM budget (2 in + 1 out double-buffered,
    resident table, one-hot intermediate), multiple of 8, and split so the
    'parallel' grid has >=2 steps for the two v7x TensorCores."""
    if tile_rows is None:
        fixed = 2 * k_pad * r * 4                              # resident fused table
        per_row = (2 + 2) * r * 4 + 2 * 128 * 4 + k_chunk * 4 + r * 4
        cap = (_VMEM_TILE_BUDGET - fixed) // per_row
        cap = max(8, min(_MAX_TILE_ROWS, (cap // 8) * 8))
    else:
        cap = max(8, (int(tile_rows) // 8) * 8)
    if bn <= cap:
        tm = bn                                                # full-extent block (always legal)
        if bn >= 16:                                           # give v7x's 2 TCs >= 2 tiles
            tm = _round_up(pl.cdiv(bn, 2), 8)
    else:
        tm = cap
    return tm


# ----------------------------------------------------------------------------
# Forward
# ----------------------------------------------------------------------------
def conditional_probability_forward(cond_ids, full_logit_priors, fused_table,
                                    sentinel_idx, sparse_output=True,
                                    tile_rows=None, min_pallas_rows=256,
                                    force_pallas=False):
    """JAX/Pallas equivalent of CondtionalProbabilityModel.forward.

    cond_ids:          int32 [B, N]      conditional index per (graph, node), -1 = none
    full_logit_priors: f32   [B, N, R] (or [B, N*R])
    fused_table:       f32   [Kpad, R]   from prepare_fused_table (cached)
    sentinel_idx:      int               row index of the NEG_BIG sentinel (== C)
    """
    B, N = cond_ids.shape
    k_pad, R = fused_table.shape
    bn = B * N

    ids = jnp.where(cond_ids >= 0, cond_ids, sentinel_idx).astype(jnp.int32).reshape(bn, 1)
    priors = jnp.asarray(full_logit_priors, dtype=jnp.float32).reshape(bn, R)

    if bn < min_pallas_rows and not force_pallas:
        # Small-problem fast path: single fused take+add beats a 1-tile
        # pallas_call launch at these sizes.
        masked = jnp.take(fused_table, ids[:, 0], axis=0) + priors
    else:
        k_chunk = min(_K_CHUNK, k_pad)
        tm = _derive_tile_rows(bn, R, k_pad, k_chunk, tile_rows)
        grid = (pl.cdiv(bn, tm),)        # partial last block handled by Pallas (no pad/trim copies)
        kernel = functools.partial(_cond_prob_kernel, k_chunk=k_chunk)
        masked = pl.pallas_call(
            kernel,
            grid_spec=pl.GridSpec(
                grid=grid,
                in_specs=[
                    pl.BlockSpec((tm, 1), lambda i: (i, 0)),       # cond indices per row
                    pl.BlockSpec((k_pad, R), lambda i: (0, 0)),    # fused table (resident)
                    pl.BlockSpec((tm, R), lambda i: (i, 0)),       # priors row tile
                ],
                out_specs=pl.BlockSpec((tm, R), lambda i: (i, 0)),
            ),
            out_shape=jax.ShapeDtypeStruct((bn, R), jnp.float32),
            compiler_params=pltpu.CompilerParams(
                dimension_semantics=("parallel",),                 # independent row tiles
                vmem_limit_bytes=_VMEM_LIMIT_BYTES),
        )(ids, fused_table, priors)

    masked_logits = masked.reshape(B, N * R)
    used_priors = priors.reshape(B, N * R)        # unmodified input; no kernel writeback

    out = {"masked_policy_logits": masked_logits, "used_priors": used_priors}

    if sparse_output:
        # Device-side validity mask; only the ragged per-row packing stays on host.
        # TODO(synk): ragged (variable-length) outputs have no fixed-shape Pallas
        # equivalent; packing mirrors the original Python list construction.
        valid_mask = masked_logits > jnp.float32(NEG_BIG)
        ml = np.asarray(masked_logits)
        mk = np.asarray(valid_mask)
        out["valid_policy_logits"] = []
        out["action_inds"] = []
        for i in range(B):
            idx = np.flatnonzero(mk[i])
            out["action_inds"].append(idx)
            out["valid_policy_logits"].append(ml[i, idx])
    return out


# ----------------------------------------------------------------------------
# Reference + tests
# ----------------------------------------------------------------------------
def _reference_forward(cond_ids, unconditionals, conditionals, priors):
    """Plain numpy reference mirroring the PyTorch semantics."""
    cond_ids = np.asarray(cond_ids)
    unconditionals = np.asarray(unconditionals)
    conditionals = np.asarray(conditionals)
    priors = np.asarray(priors)
    B, N = cond_ids.shape
    R = conditionals.shape[1]
    action_logits = np.full((B, N, R), NEG_BIG, dtype=np.float32)
    for b in range(B):
        for n in range(N):
            c = cond_ids[b, n]
            if c >= 0:
                action_logits[b, n] = unconditionals + conditionals[c]
    masked = action_logits.reshape(B, -1) + priors.reshape(B, -1)
    return masked, priors.reshape(B, -1)


def _run_case(key, B, N, C, R, force_pallas):
    k1, k2, k3, k4 = jax.random.split(key, 4)
    unconditionals = jax.random.normal(k1, (R,), dtype=jnp.float32) * 0.1
    conditionals = jax.random.normal(k2, (C, R), dtype=jnp.float32) * 0.1
    # Host-side stand-in for the grammar/graph traversal: per (graph, node)
    # conditional index, -1 == node has no condition.
    cond_ids = jax.random.randint(k3, (B, N), -1, C, dtype=jnp.int32)
    allow = jax.random.bernoulli(k4, 0.6, (B, N, R))
    full_logit_priors = jnp.where(allow, 0.0, NEG_BIG).astype(jnp.float32)

    table, sentinel = prepare_fused_table(unconditionals, conditionals)  # cached per param update
    out = conditional_probability_forward(
        cond_ids, full_logit_priors, table, sentinel,
        sparse_output=True, force_pallas=force_pallas)
    jax.block_until_ready(out["masked_policy_logits"])
    jax.block_until_ready(out["used_priors"])

    ref_masked, ref_priors = _reference_forward(
        cond_ids, unconditionals, conditionals, full_logit_priors)
    np.testing.assert_allclose(np.asarray(out["masked_policy_logits"]),
                               ref_masked, rtol=1e-6, atol=1e-5)
    np.testing.assert_allclose(np.asarray(out["used_priors"]),
                               ref_priors, rtol=1e-6, atol=1e-6)
    for i in range(B):
        ref_idx = np.flatnonzero(ref_masked[i] > NEG_BIG)
        np.testing.assert_array_equal(np.asarray(out["action_inds"][i]), ref_idx)
        np.testing.assert_allclose(np.asarray(out["valid_policy_logits"][i]),
                                   ref_masked[i, ref_idx], rtol=1e-6, atol=1e-5)


if __name__ == "__main__":
    key = jax.random.PRNGKey(0)
    # 1) Lane-dense R (128-multiple), Pallas path with 2 parallel row tiles.
    _run_case(key, B=4, N=96, C=16, R=128, force_pallas=True)
    # 2) Odd shapes (rows / K / R unaligned) + partial last block in the grid.
    _run_case(key, B=5, N=55, C=7, R=96, force_pallas=True)
    # 3) Tiny problem -> small-problem fast path (take + add, no pallas_call).
    _run_case(key, B=2, N=8, C=16, R=128, force_pallas=False)
    print("KERNEL_OK")
</pallas_src>

<mosaic_0001>
module attributes {stable_mosaic.version = 11 : i64} {
  func.func @_cond_prob_kernel(%arg0: i32, %arg1: memref<192x1xi32, #tpu.memory_space<vmem>>, %arg2: memref<24x128xf32, #tpu.memory_space<vmem>>, %arg3: memref<192x128xf32, #tpu.memory_space<vmem>>, %arg4: memref<192x128xf32, #tpu.memory_space<vmem>>) attributes {dimension_semantics = [#tpu.dimension_semantics<parallel>], iteration_bounds = array<i64: 2>, scalar_prefetch = 0 : i64, scratch_operands = 0 : i64, tpu.core_type = #tpu.core_type<tc>, window_params = [{transform_indices = @transform_0, window_bounds = array<i64: 192, 1>}, {pipeline_mode = #tpu.pipeline_mode<synchronous>, transform_indices = @transform_1, window_bounds = array<i64: 24, 128>}, {transform_indices = @transform_2, window_bounds = array<i64: 192, 128>}, {transform_indices = @transform_3, window_bounds = array<i64: 192, 128>}]} {
    %c0 = arith.constant 0 : index
    %c0_0 = arith.constant 0 : index
    %0 = vector.load %arg1[%c0, %c0_0] : memref<192x1xi32, #tpu.memory_space<vmem>>, vector<192x1xi32>
    %c0_1 = arith.constant 0 : index
    %c0_2 = arith.constant 0 : index
    %1 = vector.load %arg3[%c0_1, %c0_2] : memref<192x128xf32, #tpu.memory_space<vmem>>, vector<192x128xf32>
    %2 = tpu.iota {dimensions = array<i32: 1>} : vector<192x24xi32>
    %c0_i32 = arith.constant 0 : i32
    %3 = vector.broadcast %c0_i32 : i32 to vector<192x24xi32>
    %4 = arith.addi %2, %3 : vector<192x24xi32>
    %5 = vector.broadcast %0 : vector<192x1xi32> to vector<192x24xi32>
    %6 = arith.cmpi eq, %5, %4 : vector<192x24xi32>
    %7 = arith.extui %6 : vector<192x24xi1> to vector<192x24xi32>
    %8 = arith.sitofp %7 : vector<192x24xi32> to vector<192x24xf32>
    %c0_3 = arith.constant 0 : index
    %c0_4 = arith.constant 0 : index
    %9 = vector.load %arg2[%c0_3, %c0_4] : memref<24x128xf32, #tpu.memory_space<vmem>>, vector<24x128xf32>
    %cst = arith.constant dense<0.000000e+00> : vector<192x128xf32>
    %10 = tpu.matmul %8, %9, %cst {dimension_numbers = #tpu.dot_dimension_numbers<[1], [0], [0], [1], [0, 0, 1, 1], [], []>, precision = #tpu.contract_precision<fp32>} : vector<192x24xf32>, vector<24x128xf32>, vector<192x128xf32> -> vector<192x128xf32>
    %11 = arith.addf %1, %10 : vector<192x128xf32>
    %c0_5 = arith.constant 0 : index
    %c0_6 = arith.constant 0 : index
    %12 = vector.load %arg4[%c0_5, %c0_6] : memref<192x128xf32, #tpu.memory_space<vmem>>, vector<192x128xf32>
    tpu.vector_store %arg4[%c0_5, %c0_6], %11 {strides = array<i32>} : memref<192x128xf32, #tpu.memory_space<vmem>>, vector<192x128xf32>,
    return
  }
  func.func @transform_0(%arg0: i32) -> (i32, i32) {
    %c0_i32 = arith.constant 0 : i32
    %c0_i32_0 = arith.constant 0 : i32
    return %arg0, %c0_i32 : i32, i32
  }
  func.func @transform_1(%arg0: i32) -> (i32, i32) {
    %c0_i32 = arith.constant 0 : i32
    %c0_i32_0 = arith.constant 0 : i32
    %c0_i32_1 = arith.constant 0 : i32
    return %c0_i32, %c0_i32_0 : i32, i32
  }
  func.func @transform_2(%arg0: i32) -> (i32, i32) {
    %c0_i32 = arith.constant 0 : i32
    %c0_i32_0 = arith.constant 0 : i32
    return %arg0, %c0_i32 : i32, i32
  }
  func.func @transform_3(%arg0: i32) -> (i32, i32) {
    %c0_i32 = arith.constant 0 : i32
    %c0_i32_0 = arith.constant 0 : i32
    return %arg0, %c0_i32 : i32, i32
  }
}

</mosaic_0001>

<bundles_post_ra>
// kernel: tpu_custom_call.1
= control target key start
LH: loop header
LB: loop body
LE: loop exit
PB: predicated region body
PF: predicated region fallthrough
CT: control target
= control target key end

     0   :  { %8 = vsyncpa [#allocation3], 0  ;;  %s3621_s0 = inlined_call_operand.vmem [shape: s32[384,1], index: 0, kind: input, shape index: {}]   ;;  %s3622_s1 = inlined_call_operand.hbm [shape: f32[24,128], index: 1, kind: input, shape index: {}]   ;;  %s3623_s2 = inlined_call_operand.vmem [shape: f32[384,128], index: 2, kind: input, shape index: {}]   ;;  %s3624_s3 = inlined_call_operand.hbm [shape: f32[384,128], index: 3, kind: output, shape index: {}]  }
   0x1   :  { %9 = vsyncpa [#allocation4], 0 }
   0x2   :  { %11 = vsyncpa [#allocation4 + $0x1], 0  ;;  %s2937_s12 = smov 0   ;;  %s2939_s13 = smov 0  }
   0x3   :  { %s2941_s14 = smov 0   ;;  %s2943_s15 = smov 0  }
   0x4 LB: > { %s2958_s16 = sadd.s32 4294967295, %s2907_s15   ;;  %s2088_s17 = sadd.s32 4294967294, %s2907_s15   ;;  %s2907_s15 = sphi %s2943_s15, %s3646_s15   ;;  %s2903_s14 = sphi %s2941_s14, %s3645_s14   ;;  %s2899_s13 = sphi %s2939_s13, %s3644_s13   ;;  %s2895_s12 = sphi %s2937_s12, %s3643_s12  }
   0x5   : > { %s2962_s18 = sadd.s32 1, %s2907_s15   ;;  %s97_s19 = sadd.s32 1, %s2903_s14 }
   0x6   : > { %s94_s20 = ssub.s32 %s2907_s15, %s2962_s18  ;;  %p107_p0 = scmp.ne.s32.totalorder %s2903_s14, %s2899_s13 }
   0x7   : > { %p95_p1 = scmp.eq.s32.totalorder %s94_s20, 0  ;;  %p108_p2 = scmp.eq.s32.totalorder %s2958_s16, 1 }
   0x8   : > { %p113_p3 = scmp.ne.s32.totalorder %s2899_s13, %s2895_s12  ;;  %p114_p4 = scmp.eq.s32.totalorder %s2088_s17, 1 }
   0x9   : > { %s2973_s21 = scalar_select %p95_p1, %s2903_s14, %s97_s19  }
   0xa   : > { %p2975_p5 = por %p108_p2, %p107_p0  ;;  %p2979_p6 = por %p114_p4, %p113_p3 }
   0xb   : > { %p2089_p7 = scmp.ge.s32.totalorder %s2907_s15, 1  ;;  %p121_p8 = scmp.lt.s32.totalorder %s2907_s15, 3 }
   0xc   : > { %s3630_s22 = scalar_select %p2975_p5, 1, 0 }
   0xd   : > { %s3631_s23 = scalar_select %p2979_p6, 1, 0 }
   0xe   : > { %p3625_p9 = scmp.eq.s32.totalorder %s2958_s16, 0  ;;  %p2986_p10 = pnand %p2089_p7, %p121_p8 }
   0xf   : > { %s2909_s25 = smov [#allocation2]   ;;  %s2813_s30 = scalar_lea.hbm %s3622_s1, 384 }
  0x10   : > { %s3632_s24 = scalar_select %p2986_p10, 1, 0 }
  0x11   : > { %s133_s26 = sshll.u32 %s2909_s25, 4  ;;  %p2761_p11 = pneg %p2986_p10  ;;  %s134_s26 = int_to_ptr.vmem [resolvable:$true] %s133_s26 }
  0x12   : > { %p2814_p13 = scmp.ne.s32.totalorder %s3622_s1, %s2813_s30  ;;  %p2820_p3 = scmp.lt.u32.totalorder %s2813_s30, %s3622_s1 }
  0x13   : > { %p2994_p12 = pnand %p3625_p9, %p2761_p11 }
  0x15   : > { %p2815_p0 = pneg %p2994_p12 }
  0x17   : > { %p2816_p1 = pnand %p2815_p0, %p2814_p13 }
  0x19   : > { %p2817_p2 = pneg %p2816_p1 }
  0x1b   : > { %p2822_p4 = pnand %p2820_p3, %p2817_p2 }
  0x1d   : > { %2825 = shalt.err (!%p2822_p4)
}
  0x1e   : > { %s2826_s8 = scalar_lea.vmem %s134_s26, 384  ;;  %p2834_p9 = scmp.lt.s32.totalorder %s134_s26, %s134_s26 }
  0x1f   : > { %p2827_p7 = scmp.ne.s32.totalorder %s134_s26, %s2826_s8  ;;  %p2835_p6 = scmp.lt.s32.totalorder %s2826_s8, %s2826_s8 }
  0x21   : > { %p2829_p8 = pnand %p2827_p7, %p2815_p0  ;;  %p2836_p5 = por %p2835_p6, %p2834_p9 }
  0x23   : > { %p2830_p11 = pneg %p2829_p8 }
  0x25   : > { %p2837_p10 = pnand %p2836_p5, %p2830_p11 }
  0x27   : > { %2840 = shalt.err (!%p2837_p10)
}
  0x28   : > { %s2910_s9 = smov 128   ;;  %s2911_s10 = smov 8  }
  0x29   : > { %2764 = dma.hbm_to_vmem [thread:$0]  (!%p2994_p12), %s3622_s1, 384, %s134_s26, [#allocation3], %s2910_s9, %s2910_s9, %s2911_s10  }
  0x2a   : > { %p3634_p13 = scmp.ne.s32.totalorder %s3632_s24, 0 }
  0x2c   : > { %167 = sbr.rel (%p3634_p13) target bundleno = 577 (0x241), region = 32 }
  0x33   : > { %p3635_p1 = scmp.eq.s32.totalorder %s2958_s16, 0 }
  0x35   : > { %2886 = dma.done.wait (%p3635_p1), [#allocation3], 384   ;;  %p3636_p0 = pmov %p3635_p1 }
  0x36   : > { %s196_s19 = smul.u32 24, %s2958_s16  ;;  %v2912_v0 = vmov 0   ;;  %v403_v7 = vld [vmem:[#allocation2] sm:$0xff]  ;;  %v404_v8 = vld [vmem:[#allocation2 + $0x8] sm:$0xff]  ;;  %v3037_v11 = vld [vmem:[#allocation2 + $0x10] sm:$0xff]  ;;  %v257_v43 = vlaneseq  ;;  %vm406_vm0 = vcmask 195584  }
  0x37   : > { %2888 = vsyncadd (%p3636_p0), [#allocation3], 4294966912  ;;  %2812 = vset.pattern.permute.xlu1 %v2912_v0  ;;  %2811 = vset.pattern.permute.xlu0 %v2912_v0  ;;  %v480_v9 = vand.u32 4294901760, %v403_v7  ;;  %v483_v10 = vand.u32 4294901760, %v404_v8  ;;  %v3044_v15 = vand.u32 4294901760, %v3037_v11  ;;  %v2913_v48 = vmov 0.0  }
  0x38   : > { %p197_p5 = scmp.lt.s32.totalorder %s196_s19, 47  ;;  %v3078_v44 = vand.u32 127, %v257_v43  ;;  %s193_s27 = sand.u32 1, %s2899_s13  }
  0x39   : > { %v3041_v14 = vpack.c.bf16 %v483_v10, %v480_v9  ;;  %v789_v18 = vsub.f32 %v403_v7, %v480_v9  ;;  %v796_v19 = vsub.f32 %v404_v8, %v483_v10  ;;  %v3084_v47 = vsub.f32 %v3037_v11, %v3044_v15  ;;  %s2754_s4 = smul.u32 192, %s193_s27  ;;  %p3641_p9 = scmp.ne.s32.totalorder %s3630_s22, 0 }
  0x3a   : > { %s3648_s19 = smov (!%p197_p5, %s196_s19), 47  ;;  %s2195_s6 = smul.u32 3072, %s2958_s16 }
  0x3b   : > { %s2094_s20 = sshll.u32 %s3648_s19, 3  ;;  %2623 = vmatprep.subr.bf16.mxu0 %v3041_v14  ;;  %2611 = vmatprep.subr.bf16.mxu1 %v3041_v14  ;;  %v790_v22 = vand.u32 4294901760, %v789_v18  ;;  %v797_v23 = vand.u32 4294901760, %v796_v19  ;;  %v3076_v42 = vpack.c.bf16 %v796_v19, %v789_v18  ;;  %v3103_v57 = vand.u32 4294901760, %v3084_v47  ;;  %s3522_s5 = scalar_lea.vmem [#allocation5], %s2754_s4 }
  0x3c   : > { %s3029_s26 = scalar_lea.vmem %s3621_s0, %s2094_s20  ;;  %2625 = vmatpush3.bf16.msra.mxu0 %v3041_v14  ;;  %2613 = vmatpush3.bf16.msra.mxu1 %v3041_v14  ;;  %s3515_s30 = scalar_lea.vmem %s3623_s2, %s2094_s20 }
  0x3d   : > { %v211_v1 = vld [vmem:[%s3029_s26 + $0x10] sm:$0xff]  ;;  %v209_v2 = vld [vmem:[%s3029_s26] sm:$0xff]  ;;  %v212_v3 = vld [vmem:[%s3029_s26 + $0x18] sm:$0xff]  ;;  %2488 = vmatprep.subr.mxu0 %v3044_v15  ;;  %2362 = vmatprep.subr.mxu1 %v3044_v15  ;;  %v791_v24 = vsub.f32 %v789_v18, %v790_v22  ;;  %v798_v25 = vsub.f32 %v796_v19, %v797_v23  ;;  %v3058_v26 = vpack.c.bf16 %v797_v23, %v790_v22  ;;  %s2002_s7 = sshll.u32 %s3522_s5, 4  ;;  %s3572_s10 = scalar_lea.hbm %s3624_s3, %s2195_s6  ;;  %s3574_s7 = int_to_ptr.vmem [resolvable:$true] %s2002_s7 }
  0x3e   : > { %266 = vperm.xlu1 %2812, %v211_v1   ;;  %260 = vperm.xlu0 %2811, %v209_v2   ;;  %v210_v4 = vld [vmem:[%s3029_s26 + $0x8] sm:$0xff]  ;;  %v213_v6 = vld [vmem:[%s3029_s26 + $0x20] sm:$0xff]  ;;  %v216_v12 = vld [vmem:[%s3029_s26 + $0x38] sm:$0xff]  ;;  %s3580_s16 = scalar_lea.sflag [#allocation4], %s193_s27  ;;  %s2841_s11 = scalar_lea.vmem %s3574_s7, 3072 }
  0x3f   : > { %v214_v5 = vld [vmem:[%s3029_s26 + $0x28] sm:$0xff]  ;;  %v215_v13 = vld [vmem:[%s3029_s26 + $0x30] sm:$0xff]  ;;  %v217_v17 = vld [vmem:[%s3029_s26 + $0x40] sm:$0xff]  ;;  %v792_v29 = vand.u32 4294901760, %v791_v24  ;;  %v799_v30 = vand.u32 4294901760, %v798_v25  ;;  %p2842_p6 = scmp.ne.s32.totalorder %s3574_s7, %s2841_s11  ;;  %s2914_s17 = smov [#allocation5]  }
  0x40   : > { %v218_v16 = vld [vmem:[%s3029_s26 + $0x48] sm:$0xff]  ;;  %v220_v20 = vld [vmem:[%s3029_s26 + $0x58] sm:$0xff]  ;;  %v219_v21 = vld [vmem:[%s3029_s26 + $0x50] sm:$0xff]  ;;  %2489 = vmatpush3.msra.mxu0 %v3044_v15  ;;  %2363 = vmatpush3.msra.mxu1 %v3044_v15  ;;  %s2845_s19 = sshll.u32 %s2914_s17, 4  ;;  %s2846_s19 = int_to_ptr.vmem [resolvable:$false] %s2845_s19 }
  0x41   : > { %v222_v27 = vld [vmem:[%s3029_s26 + $0x68] sm:$0xff]  ;;  %v221_v28 = vld [vmem:[%s3029_s26 + $0x60] sm:$0xff]  ;;  %2627 = vmatprep.subr.bf16.mxu0 %v3058_v26  ;;  %v3063_v31 = vpack.c.bf16 %v799_v30, %v792_v29  ;;  %v224_v32 = vld [vmem:[%s3029_s26 + $0x78] sm:$0xff]  ;;  %p2843_p10 = pnand %p2842_p6, %p3641_p9  ;;  %s2847_s20 = scalar_lea.vmem %s2846_s19, 6144 }
  0x42   : > { %269 = vperm.xlu1 %2812, %v212_v3   ;;  %263 = vperm.xlu0 %2811, %v210_v4   ;;  %v223_v33 = vld [vmem:[%s3029_s26 + $0x70] sm:$0xff]  ;;  %v226_v34 = vld [vmem:[%s3029_s26 + $0x88] sm:$0xff]  ;;  %v225_v35 = vld [vmem:[%s3029_s26 + $0x80] sm:$0xff]  ;;  %p2848_p2 = scmp.lt.s32.totalorder %s3574_s7, %s2846_s19  ;;  %p2849_p3 = scmp.lt.s32.totalorder %s2847_s20, %s2841_s11 }
  0x43   : > { %2615 = vmatprep.subr.bf16.mxu1 %v3063_v31  ;;  %v228_v36 = vld [vmem:[%s3029_s26 + $0x98] sm:$0xff]  ;;  %v227_v37 = vld [vmem:[%s3029_s26 + $0x90] sm:$0xff]  ;;  %v230_v38 = vld [vmem:[%s3029_s26 + $0xa8] sm:$0xff]  ;;  %p2844_p12 = pneg %p2843_p10 }
  0x44   : > { %v229_v39 = vld [vmem:[%s3029_s26 + $0xa0] sm:$0xff]  ;;  %v232_v40 = vld [vmem:[%s3029_s26 + $0xb8] sm:$0xff]  ;;  %v231_v41 = vld [vmem:[%s3029_s26 + $0xb0] sm:$0xff]  ;;  %p2850_p4 = por %p2849_p3, %p2848_p2 }
  0x46   : > { %275 = vperm.xlu1 %2812, %v214_v5   ;;  %272 = vperm.xlu0 %2811, %v213_v6   ;;  %v805_v5 = vsub.f32 %v3084_v47, %v3103_v57  ;;  %p2851_p7 = pnand %p2850_p4, %p2844_p12 }
  0x48   : > { %v806_v22 = vand.u32 4294901760, %v805_v5 }
  0x4a   : > { %281 = vperm.xlu1 %2812, %v216_v12   ;;  %278 = vperm.xlu0 %2811, %v215_v13  }
  0x4e   : > { %287 = vperm.xlu1 %2812, %v218_v16   ;;  %284 = vperm.xlu0 %2811, %v217_v17  }
  0x52   : > { %293 = vperm.xlu1 %2812, %v220_v20   ;;  %290 = vperm.xlu0 %2811, %v219_v21  }
  0x56   : > { %299 = vperm.xlu1 %2812, %v222_v27   ;;  %296 = vperm.xlu0 %2811, %v221_v28  }
  0x5a   : > { %305 = vperm.xlu1 %2812, %v224_v32   ;;  %302 = vperm.xlu0 %2811, %v223_v33  }
  0x5e   : > { %311 = vperm.xlu1 %2812, %v226_v34   ;;  %308 = vperm.xlu0 %2811, %v225_v35  }
  0x62   : > { %317 = vperm.xlu1 %2812, %v228_v36   ;;  %314 = vperm.xlu0 %2811, %v227_v37  }
  0x66   : > { %323 = vperm.xlu1 %2812, %v230_v38   ;;  %320 = vperm.xlu0 %2811, %v229_v39  }
  0x6a   : > { %329 = vperm.xlu1 %2812, %v232_v40   ;;  %326 = vperm.xlu0 %2811, %v231_v41  }
  0xbd   : > { %v267_v45 = vpop.permute.xlu1 %266  ;;  %v261_v46 = vpop.permute.xlu0 %260 }
  0xbe   : > { %vm333_vm1 = vcmp.eq.s32.totalorder %v267_v45, %v3078_v44  ;;  %vm331_vm2 = vcmp.eq.s32.totalorder %v261_v46, %v3078_v44 }
  0xbf   : > { %v3087_v49 = vsel %vm333_vm1, 1.0, %v2913_v48  ;;  %v3090_v50 = vsel %vm331_vm2, 1.0, %v2913_v48 }
  0xc0   : > { %v414_v51 = vsel %vm406_vm0, %v3087_v49, 0  ;;  %v408_v52 = vsel %vm406_vm0, %v3090_v50, 0 }
  0xc1   : > { %v3096_v53 = vsub.f32 %v414_v51, %v414_v51  ;;  %v3098_v54 = vsub.f32 %v408_v52, %v408_v52  ;;  %v270_v55 = vpop.permute.xlu1 %269  ;;  %v264_v56 = vpop.permute.xlu0 %263 }
  0xc2   : > { %vm334_vm3 = vcmp.eq.s32.totalorder %v270_v55, %v3078_v44  ;;  %vm332_vm4 = vcmp.eq.s32.totalorder %v264_v56, %v3078_v44 }
  0xc3   : > { %v3106_v58 = vsel %vm334_vm3, 1.0, %v2913_v48  ;;  %v3109_v59 = vsel %vm332_vm4, 1.0, %v2913_v48  ;;  %v549_v60 = vand.u32 4294901760, %v3098_v54  ;;  %v569_v63 = vand.u32 4294901760, %v3096_v53 }
  0xc4   : > { %v417_v61 = vsel %vm406_vm0, %v3106_v58, 0  ;;  %v411_v62 = vsel %vm406_vm0, %v3109_v59, 0 }
  0xc5   : > { %v3117_v0 = vsub.f32 %v417_v61, %v417_v61  ;;  %v3119_v1 = vsub.f32 %v411_v62, %v411_v62  ;;  %v276_v2 = vpop.permute.xlu1 %275  ;;  %2490 = vmatprep.mubr.f32.mxu0 %v549_v60  ;;  %v273_v3 = vpop.permute.xlu0 %272  ;;  %v550_v4 = vsub.f32 %v3098_v54, %v549_v60  ;;  %v570_v13 = vsub.f32 %v3096_v53, %v569_v63 }
  0xc6   : > { %vm336_vm5 = vcmp.eq.s32.totalorder %v276_v2, %v3078_v44  ;;  %vm335_vm6 = vcmp.eq.s32.totalorder %v273_v3, %v3078_v44 }
  0xc7   : > { %v3127_v6 = vsel %vm336_vm5, 1.0, %v2913_v48  ;;  %v3130_v7 = vsel %vm335_vm6, 1.0, %v2913_v48  ;;  %v551_v8 = vand.u32 4294901760, %v550_v4  ;;  %v559_v9 = vand.u32 4294901760, %v3119_v1 }
  0xc8   : > { %v423_v10 = vsel %vm406_vm0, %v3127_v6, 0  ;;  %v420_v11 = vsel %vm406_vm0, %v3130_v7, 0  ;;  %v579_v12 = vand.u32 4294901760, %v3117_v0  ;;  %v571_v29 = vand.u32 4294901760, %v570_v13 }
  0xc9   : > { %v3139_v16 = vsub.f32 %v423_v10, %v423_v10  ;;  %v3141_v17 = vsub.f32 %v420_v11, %v420_v11  ;;  %v282_v18 = vpop.permute.xlu1 %281  ;;  %2364 = vmatprep.mubr.f32.mxu1 %v551_v8  ;;  %2491 = vmatmul.mubr.f32.vlgmr.msra.gmra.mrb[0].mxu0 %v559_v9  ;;  %v279_v19 = vpop.permute.xlu0 %278  ;;  %v560_v20 = vsub.f32 %v3119_v1, %v559_v9 }
  0xca   : > { %vm338_vm7 = vcmp.eq.s32.totalorder %v282_v18, %v3078_v44  ;;  %vm337_vm8 = vcmp.eq.s32.totalorder %v279_v19, %v3078_v44  ;;  %2493 = vmatprep.mubr.f32.mxu0 %v569_v63  ;;  %2629 = vmatpush3.bf16.msra.mxu0 %v3058_v26  ;;  %v580_v21 = vsub.f32 %v3117_v0, %v579_v12 }
  0xcb   : > { %v3149_v23 = vsel %vm338_vm7, 1.0, %v2913_v48  ;;  %v3152_v24 = vsel %vm337_vm8, 1.0, %v2913_v48  ;;  %v561_v25 = vand.u32 4294901760, %v560_v20  ;;  %v589_v27 = vand.u32 4294901760, %v3141_v17  ;;  %2530 = vmatprep.subr.mxu0 %v3103_v57 }
  0xcc   : > { %v429_v28 = vsel %vm406_vm0, %v3149_v23, 0  ;;  %v426_v26 = vsel %vm406_vm0, %v3152_v24, 0  ;;  %v599_v30 = vand.u32 4294901760, %v3139_v16  ;;  %v581_v37 = vand.u32 4294901760, %v580_v21 }
  0xcd   : > { %v3161_v32 = vsub.f32 %v429_v28, %v429_v28  ;;  %v3163_v33 = vsub.f32 %v426_v26, %v426_v26  ;;  %v288_v34 = vpop.permute.xlu1 %287  ;;  %2365 = vmatmul.mubr.f32.vlgmr.msra.gmra.mrb[0].mxu1 %v561_v25  ;;  %2494 = vmatmul.mubr.f32.gmra.mrb[2].mxu0 %v579_v12  ;;  %v285_v35 = vpop.permute.xlu0 %284  ;;  %v590_v36 = vsub.f32 %v3141_v17, %v589_v27 }
  0xce   : > { %vm340_vm9 = vcmp.eq.s32.totalorder %v288_v34, %v3078_v44  ;;  %2617 = vmatpush3.bf16.msra.mxu1 %v3063_v31  ;;  %vm339_vm10 = vcmp.eq.s32.totalorder %v285_v35, %v3078_v44  ;;  %2367 = vmatprep.mubr.f32.mxu1 %v571_v29  ;;  %v600_v38 = vsub.f32 %v3139_v16, %v599_v30 }
  0xcf   : > { %v3171_v39 = vsel %vm340_vm9, 1.0, %v2913_v48  ;;  %v3174_v40 = vsel %vm339_vm10, 1.0, %v2913_v48  ;;  %2496 = vmatprep.mubr.f32.mxu0 %v589_v27  ;;  %v591_v41 = vand.u32 4294901760, %v590_v36  ;;  %v609_v43 = vand.u32 4294901760, %v3163_v33  ;;  %2404 = vmatprep.subr.mxu1 %v806_v22 }
  0xd0   : > { %v435_v31 = vsel %vm406_vm0, %v3171_v39, 0  ;;  %v432_v45 = vsel %vm406_vm0, %v3174_v40, 0  ;;  %v619_v46 = vand.u32 4294901760, %v3161_v32  ;;  %2531 = vmatpush3.msra.mxu0 %v3103_v57  ;;  %v601_v61 = vand.u32 4294901760, %v600_v38 }
  0xd1   : > { %v3183_v51 = vsub.f32 %v435_v31, %v435_v31  ;;  %v3185_v52 = vsub.f32 %v432_v45, %v432_v45  ;;  %v294_v55 = vpop.permute.xlu1 %293  ;;  %2368 = vmatmul.mubr.f32.gmra.mrb[2].mxu1 %v581_v37  ;;  %2497 = vmatmul.mubr.f32.gmra.mrb[4].mxu0 %v599_v30  ;;  %v291_v56 = vpop.permute.xlu0 %290  ;;  %v610_v60 = vsub.f32 %v3163_v33, %v609_v43 }
  0xd2   : > { %vm342_vm11 = vcmp.eq.s32.totalorder %v294_v55, %v3078_v44  ;;  %vm341_vm12 = vcmp.eq.s32.totalorder %v291_v56, %v3078_v44  ;;  %2370 = vmatprep.mubr.f32.mxu1 %v591_v41  ;;  %2499 = vmatprep.mubr.f32.mxu0 %v609_v43  ;;  %v620_v62 = vsub.f32 %v3161_v32, %v619_v46 }
  0xd3   : > { %v3192_v57 = vsel %vm342_vm11, 1.0, %v2913_v48  ;;  %v3195_v63 = vsel %vm341_vm12, 1.0, %v2913_v48  ;;  %v611_v2 = vand.u32 4294901760, %v610_v60  ;;  %v629_v3 = vand.u32 4294901760, %v3185_v52  ;;  %2405 = vmatpush3.msra.mxu1 %v806_v22  ;;  %2631 = vmatprep.subr.bf16.mxu0 %v3041_v14 }
  0xd4   : > { %v441_v4 = vsel %vm406_vm0, %v3192_v57, 0  ;;  %v438_v5 = vsel %vm406_vm0, %v3195_v63, 0  ;;  %v639_v8 = vand.u32 4294901760, %v3183_v51  ;;  %2619 = vmatprep.subr.bf16.mxu1 %v3076_v42  ;;  %v621_v18 = vand.u32 4294901760, %v620_v62 }
  0xd5   : > { %v3205_v9 = vsub.f32 %v441_v4, %v441_v4  ;;  %v3207_v10 = vsub.f32 %v438_v5, %v438_v5  ;;  %v300_v11 = vpop.permute.xlu1 %299  ;;  %2371 = vmatmul.mubr.f32.gmra.mrb[4].mxu1 %v601_v61  ;;  %2500 = vmatmul.mubr.f32.gmra.mrb[6].mxu0 %v619_v46  ;;  %v297_v12 = vpop.permute.xlu0 %296  ;;  %v630_v13 = vsub.f32 %v3185_v52, %v629_v3 }
  0xd6   : > { %vm344_vm13 = vcmp.eq.s32.totalorder %v300_v11, %v3078_v44  ;;  %vm343_vm14 = vcmp.eq.s32.totalorder %v297_v12, %v3078_v44  ;;  %2373 = vmatprep.mubr.f32.mxu1 %v611_v2  ;;  %2502 = vmatprep.mubr.f32.mxu0 %v629_v3  ;;  %v640_v19 = vsub.f32 %v3183_v51, %v639_v8 }
  0xd7   : > { %v3214_v20 = vsel %vm344_vm13, 1.0, %v2913_v48  ;;  %v3217_v21 = vsel %vm343_vm14, 1.0, %v2913_v48  ;;  %v631_v22 = vand.u32 4294901760, %v630_v13  ;;  %v649_v25 = vand.u32 4294901760, %v3207_v10 }
  0xd8   : > { %v447_v27 = vsel %vm406_vm0, %v3214_v20, 0  ;;  %v444_v28 = vsel %vm406_vm0, %v3217_v21, 0  ;;  %v659_v26 = vand.u32 4294901760, %v3205_v9  ;;  %v641_v37 = vand.u32 4294901760, %v640_v19 }
  0xd9   : > { %v3225_v29 = vsub.f32 %v447_v27, %v447_v27  ;;  %v3227_v30 = vsub.f32 %v444_v28, %v444_v28  ;;  %v306_v34 = vpop.permute.xlu1 %305  ;;  %2374 = vmatmul.mubr.f32.gmra.mrb[6].mxu1 %v621_v18  ;;  %2503 = vmatmul.mubr.f32.gmra.mrb[8].mxu0 %v639_v8  ;;  %v303_v35 = vpop.permute.xlu0 %302  ;;  %v650_v36 = vsub.f32 %v3207_v10, %v649_v25 }
  0xda   : > { %vm346_vm15 = vcmp.eq.s32.totalorder %v306_v34, %v3078_v44  ;;  %vm345_vm1 = vcmp.eq.s32.totalorder %v303_v35, %v3078_v44  ;;  %2376 = vmatprep.mubr.f32.mxu1 %v631_v22  ;;  %2505 = vmatprep.mubr.f32.mxu0 %v649_v25  ;;  %v660_v38 = vsub.f32 %v3205_v9, %v659_v26 }
  0xdb   : > { %v3234_v41 = vsel %vm346_vm15, 1.0, %v2913_v48  ;;  %v3237_v43 = vsel %vm345_vm1, 1.0, %v2913_v48  ;;  %v651_v31 = vand.u32 4294901760, %v650_v36  ;;  %v669_v45 = vand.u32 4294901760, %v3227_v30 }
  0xdc   : > { %v453_v46 = vsel %vm406_vm0, %v3234_v41, 0  ;;  %v450_v55 = vsel %vm406_vm0, %v3237_v43, 0  ;;  %v679_v56 = vand.u32 4294901760, %v3225_v29  ;;  %v661_v4 = vand.u32 4294901760, %v660_v38 }
  0xdd   : > { %v3245_v60 = vsub.f32 %v453_v46, %v453_v46  ;;  %v3247_v61 = vsub.f32 %v450_v55, %v450_v55  ;;  %v312_v62 = vpop.permute.xlu1 %311  ;;  %2377 = vmatmul.mubr.f32.gmra.mrb[8].mxu1 %v641_v37  ;;  %2506 = vmatmul.mubr.f32.gmra.mrb[10].mxu0 %v659_v26  ;;  %v309_v2 = vpop.permute.xlu0 %308  ;;  %v670_v3 = vsub.f32 %v3227_v30, %v669_v45 }
  0xde   : > { %vm348_vm2 = vcmp.eq.s32.totalorder %v312_v62, %v3078_v44  ;;  %vm347_vm3 = vcmp.eq.s32.totalorder %v309_v2, %v3078_v44  ;;  %2379 = vmatprep.mubr.f32.mxu1 %v651_v31  ;;  %2508 = vmatprep.mubr.f32.mxu0 %v669_v45  ;;  %v680_v5 = vsub.f32 %v3225_v29, %v679_v56 }
  0xdf   : > { %v3254_v8 = vsel %vm348_vm2, 1.0, %v2913_v48  ;;  %v3257_v11 = vsel %vm347_vm3, 1.0, %v2913_v48  ;;  %v671_v12 = vand.u32 4294901760, %v670_v3  ;;  %v689_v13 = vand.u32 4294901760, %v3247_v61 }
  0xe0   : > { %v459_v18 = vsel %vm406_vm0, %v3254_v8, 0  ;;  %v456_v19 = vsel %vm406_vm0, %v3257_v11, 0  ;;  %v699_v22 = vand.u32 4294901760, %v3245_v60  ;;  %v681_v35 = vand.u32 4294901760, %v680_v5 }
  0xe1   : > { %v3265_v25 = vsub.f32 %v459_v18, %v459_v18  ;;  %v3267_v27 = vsub.f32 %v456_v19, %v456_v19  ;;  %v318_v28 = vpop.permute.xlu1 %317  ;;  %2380 = vmatmul.mubr.f32.gmra.mrb[10].mxu1 %v661_v4  ;;  %2509 = vmatmul.mubr.f32.gmra.mrb[12].mxu0 %v679_v56  ;;  %v315_v26 = vpop.permute.xlu0 %314  ;;  %v690_v34 = vsub.f32 %v3247_v61, %v689_v13 }
  0xe2   : > { %vm350_vm4 = vcmp.eq.s32.totalorder %v318_v28, %v3078_v44  ;;  %vm349_vm5 = vcmp.eq.s32.totalorder %v315_v26, %v3078_v44  ;;  %2382 = vmatprep.mubr.f32.mxu1 %v671_v12  ;;  %2511 = vmatprep.mubr.f32.mxu0 %v689_v13  ;;  %v700_v36 = vsub.f32 %v3245_v60, %v699_v22 }
  0xe3   : > { %v3274_v37 = vsel %vm350_vm4, 1.0, %v2913_v48  ;;  %v3277_v38 = vsel %vm349_vm5, 1.0, %v2913_v48  ;;  %v691_v31 = vand.u32 4294901760, %v690_v34  ;;  %v709_v45 = vand.u32 4294901760, %v3267_v27 }
  0xe4   : > { %v465_v46 = vsel %vm406_vm0, %v3274_v37, 0  ;;  %v462_v55 = vsel %vm406_vm0, %v3277_v38, 0  ;;  %v719_v56 = vand.u32 4294901760, %v3265_v25  ;;  %v701_v12 = vand.u32 4294901760, %v700_v36 }
  0xe5   : > { %v3285_v62 = vsub.f32 %v465_v46, %v465_v46  ;;  %v3287_v2 = vsub.f32 %v462_v55, %v462_v55  ;;  %v324_v3 = vpop.permute.xlu1 %323  ;;  %2383 = vmatmul.mubr.f32.gmra.mrb[12].mxu1 %v681_v35  ;;  %2512 = vmatmul.mubr.f32.gmra.mrb[14].mxu0 %v699_v22  ;;  %v321_v4 = vpop.permute.xlu0 %320  ;;  %v710_v5 = vsub.f32 %v3267_v27, %v709_v45 }
  0xe6   : > { %vm352_vm6 = vcmp.eq.s32.totalorder %v324_v3, %v3078_v44  ;;  %vm351_vm7 = vcmp.eq.s32.totalorder %v321_v4, %v3078_v44  ;;  %2385 = vmatprep.mubr.f32.mxu1 %v691_v31  ;;  %2514 = vmatprep.mubr.f32.mxu0 %v709_v45  ;;  %v720_v13 = vsub.f32 %v3265_v25, %v719_v56 }
  0xe7   : > { %3637 = vst [vmem:[#allocation8_spill] sm:$0xff] %v3285_v62  ;;  %3638 = vst [vmem:[#allocation9_spill] sm:$0xff] %v3287_v2  ;;  %v3294_v18 = vsel %vm352_vm6, 1.0, %v2913_v48  ;;  %v3297_v19 = vsel %vm351_vm7, 1.0, %v2913_v48  ;;  %v711_v28 = vand.u32 4294901760, %v710_v5  ;;  %v729_v22 = vand.u32 4294901760, %v3287_v2 }
  0xe8   : > { %v471_v26 = vsel %vm406_vm0, %v3294_v18, 0  ;;  %v468_v34 = vsel %vm406_vm0, %v3297_v19, 0  ;;  %v739_v35 = vand.u32 4294901760, %v3285_v62  ;;  %v721_v3 = vand.u32 4294901760, %v720_v13 }
  0xe9   : > { %v3305_v36 = vsub.f32 %v471_v26, %v471_v26  ;;  %v3307_v31 = vsub.f32 %v468_v34, %v468_v34  ;;  %v330_v45 = vpop.permute.xlu1 %329  ;;  %2386 = vmatmul.mubr.f32.gmra.mrb[14].mxu1 %v701_v12  ;;  %2515 = vmatmul.mubr.f32.gmra.mrb[16].mxu0 %v719_v56  ;;  %v327_v46 = vpop.permute.xlu0 %326  ;;  %v730_v55 = vsub.f32 %v3287_v2, %v729_v22 }
  0xea   : > { %vm354_vm8 = vcmp.eq.s32.totalorder %v330_v45, %v3078_v44  ;;  %vm353_vm9 = vcmp.eq.s32.totalorder %v327_v46, %v3078_v44  ;;  %2388 = vmatprep.mubr.f32.mxu1 %v711_v28  ;;  %2517 = vmatprep.mubr.f32.mxu0 %v729_v22  ;;  %v740_v4 = vsub.f32 %v3285_v62, %v739_v35 }
  0xeb   : > { %v3314_v5 = vsel %vm354_vm8, 1.0, %v2913_v48  ;;  %v3317_v26 = vsel %vm353_vm9, 1.0, %v2913_v48  ;;  %v731_v12 = vand.u32 4294901760, %v730_v55  ;;  %v749_v56 = vand.u32 4294901760, %v3307_v31 }
  0xec   : > { %v477_v34 = vsel %vm406_vm0, %v3314_v5, 0  ;;  %v474_v44 = vsel %vm406_vm0, %v3317_v26, 0  ;;  %v759_v28 = vand.u32 4294901760, %v3305_v36  ;;  %v741_v45 = vand.u32 4294901760, %v740_v4 }
  0xed   : > { %v3325_v13 = vsub.f32 %v477_v34, %v477_v34  ;;  %v3327_v22 = vsub.f32 %v474_v44, %v474_v44  ;;  %2389 = vmatmul.mubr.f32.gmra.mrb[16].mxu1 %v721_v3  ;;  %2518 = vmatmul.mubr.f32.gmra.mrb[18].mxu0 %v739_v35  ;;  %v750_v48 = vsub.f32 %v3307_v31, %v749_v56 }
  0xee   : > { %2391 = vmatprep.mubr.f32.mxu1 %v731_v12  ;;  %2520 = vmatprep.mubr.f32.mxu0 %v749_v56  ;;  %v760_v62 = vsub.f32 %v3305_v36, %v759_v28 }
  0xef   : > { %v751_v46 = vand.u32 4294901760, %v750_v48  ;;  %v769_v55 = vand.u32 4294901760, %v3327_v22  ;;  %v779_v2 = vand.u32 4294901760, %v3325_v13 }
  0xf0   : > { %v761_v3 = vand.u32 4294901760, %v760_v62 }
  0xf1   : > { %2392 = vmatmul.mubr.f32.gmra.mrb[18].mxu1 %v741_v45  ;;  %2521 = vmatmul.mubr.f32.gmra.mrb[20].mxu0 %v759_v28  ;;  %v770_v34 = vsub.f32 %v3327_v22, %v769_v55  ;;  %v780_v44 = vsub.f32 %v3325_v13, %v779_v2 }
  0xf2   : > { %2394 = vmatprep.mubr.f32.mxu1 %v751_v46  ;;  %2523 = vmatprep.mubr.f32.mxu0 %v769_v55  ;;  %v243_v55 = vld [vmem:[%s3515_s30 + $0x50] sm:$0xff] }
  0xf3   : > { %v771_v35 = vand.u32 4294901760, %v770_v34  ;;  %v781_v4 = vand.u32 4294901760, %v780_v44 }
  0xf5   : > { %2395 = vmatmul.mubr.f32.gmra.mrb[20].mxu1 %v761_v3  ;;  %2524 = vmatmul.mubr.f32.gmra.mrb[22].mxu0 %v779_v2 }
  0xf6   : > { %2397 = vmatprep.mubr.f32.mxu1 %v771_v35  ;;  %2532 = vmatprep.mubr.msk.f32.mxu0 %vm406_vm0, %v3090_v50 }
  0xf9   : > { %2398 = vmatmul.mubr.f32.gmra.mrb[22].mxu1 %v781_v4  ;;  %2533 = vmatmul.mubr.msk.f32.vlgmr.msra.gmra.mrb[0].mxu0 %vm406_vm0, %v3109_v59 }
  0xfa   : > { %2406 = vmatprep.mubr.msk.f32.mxu1 %vm406_vm0, %v3090_v50  ;;  %2535 = vmatprep.mubr.msk.f32.mxu0 %vm406_vm0, %v3087_v49 }
  0xfb   : > { %2633 = vmatpush3.bf16.msra.mxu0 %v3041_v14  ;;  %v3639_v14 = vld [vmem:[#allocation9_spill] sm:$0xff] }
  0xfc   : > { %2572 = vmatprep.subr.mxu0 %v3044_v15 }
  0xfd   : > { %2407 = vmatmul.mubr.msk.f32.vlgmr.msra.gmra.mrb[0].mxu1 %vm406_vm0, %v3109_v59  ;;  %2536 = vmatmul.mubr.msk.f32.gmra.mrb[2].mxu0 %vm406_vm0, %v3106_v58 }
  0xfe   : > { %2621 = vmatpush3.bf16.msra.mxu1 %v3076_v42  ;;  %2409 = vmatprep.mubr.msk.f32.mxu1 %vm406_vm0, %v3087_v49 }
  0xff   : > { %2538 = vmatprep.mubr.msk.f32.mxu0 %vm406_vm0, %v3130_v7  ;;  %2446 = vmatprep.subr.mxu1 %v3084_v47 }
 0x100   : > { %2573 = vmatpush3.msra.mxu0 %v3044_v15  ;;  %v3640_v15 = vld [vmem:[#allocation8_spill] sm:$0xff] }
 0x101   : > { %2410 = vmatmul.mubr.msk.f32.gmra.mrb[2].mxu1 %vm406_vm0, %v3106_v58  ;;  %2539 = vmatmul.mubr.msk.f32.gmra.mrb[4].mxu0 %vm406_vm0, %v3127_v6 }
 0x102   : > { %2412 = vmatprep.mubr.msk.f32.mxu1 %vm406_vm0, %v3130_v7  ;;  %2541 = vmatprep.mubr.msk.f32.mxu0 %vm406_vm0, %v3152_v24 }
 0x103   : > { %2447 = vmatpush3.msra.mxu1 %v3084_v47 }
 0x105   : > { %2413 = vmatmul.mubr.msk.f32.gmra.mrb[4].mxu1 %vm406_vm0, %v3127_v6  ;;  %2542 = vmatmul.mubr.msk.f32.gmra.mrb[6].mxu0 %vm406_vm0, %v3149_v23 }
 0x106   : > { %2415 = vmatprep.mubr.msk.f32.mxu1 %vm406_vm0, %v3152_v24  ;;  %2544 = vmatprep.mubr.msk.f32.mxu0 %vm406_vm0, %v3174_v40 }
 0x109   : > { %2416 = vmatmul.mubr.msk.f32.gmra.mrb[6].mxu1 %vm406_vm0, %v3149_v23  ;;  %2545 = vmatmul.mubr.msk.f32.gmra.mrb[8].mxu0 %vm406_vm0, %v3171_v39 }
 0x10a   : > { %2418 = vmatprep.mubr.msk.f32.mxu1 %vm406_vm0, %v3174_v40  ;;  %2547 = vmatprep.mubr.msk.f32.mxu0 %vm406_vm0, %v3195_v63 }
 0x10d   : > { %2419 = vmatmul.mubr.msk.f32.gmra.mrb[8].mxu1 %vm406_vm0, %v3171_v39  ;;  %2548 = vmatmul.mubr.msk.f32.gmra.mrb[10].mxu0 %vm406_vm0, %v3192_v57 }
 0x10e   : > { %2421 = vmatprep.mubr.msk.f32.mxu1 %vm406_vm0, %v3195_v63  ;;  %2550 = vmatprep.mubr.msk.f32.mxu0 %vm406_vm0, %v3217_v21 }
 0x111   : > { %2422 = vmatmul.mubr.msk.f32.gmra.mrb[10].mxu1 %vm406_vm0, %v3192_v57  ;;  %2551 = vmatmul.mubr.msk.f32.gmra.mrb[12].mxu0 %vm406_vm0, %v3214_v20 }
 0x112   : > { %2424 = vmatprep.mubr.msk.f32.mxu1 %vm406_vm0, %v3217_v21  ;;  %2553 = vmatprep.mubr.msk.f32.mxu0 %vm406_vm0, %v3237_v43 }
 0x115   : > { %2425 = vmatmul.mubr.msk.f32.gmra.mrb[12].mxu1 %vm406_vm0, %v3214_v20  ;;  %2554 = vmatmul.mubr.msk.f32.gmra.mrb[14].mxu0 %vm406_vm0, %v3234_v41 }
 0x116   : > { %2427 = vmatprep.mubr.msk.f32.mxu1 %vm406_vm0, %v3237_v43  ;;  %2556 = vmatprep.mubr.msk.f32.mxu0 %vm406_vm0, %v3257_v11 }
 0x119   : > { %2428 = vmatmul.mubr.msk.f32.gmra.mrb[14].mxu1 %vm406_vm0, %v3234_v41  ;;  %2557 = vmatmul.mubr.msk.f32.gmra.mrb[16].mxu0 %vm406_vm0, %v3254_v8 }
 0x11a   : > { %2430 = vmatprep.mubr.msk.f32.mxu1 %vm406_vm0, %v3257_v11  ;;  %2559 = vmatprep.mubr.msk.f32.mxu0 %vm406_vm0, %v3277_v38 }
 0x11d   : > { %2431 = vmatmul.mubr.msk.f32.gmra.mrb[16].mxu1 %vm406_vm0, %v3254_v8  ;;  %2560 = vmatmul.mubr.msk.f32.gmra.mrb[18].mxu0 %vm406_vm0, %v3274_v37 }
 0x11e   : > { %2433 = vmatprep.mubr.msk.f32.mxu1 %vm406_vm0, %v3277_v38  ;;  %2562 = vmatprep.mubr.msk.f32.mxu0 %vm406_vm0, %v3297_v19 }
 0x121   : > { %2434 = vmatmul.mubr.msk.f32.gmra.mrb[18].mxu1 %vm406_vm0, %v3274_v37  ;;  %2563 = vmatmul.mubr.msk.f32.gmra.mrb[20].mxu0 %vm406_vm0, %v3294_v18 }
 0x122   : > { %2436 = vmatprep.mubr.msk.f32.mxu1 %vm406_vm0, %v3297_v19  ;;  %2565 = vmatprep.mubr.msk.f32.mxu0 %vm406_vm0, %v3317_v26 }
 0x125   : > { %2437 = vmatmul.mubr.msk.f32.gmra.mrb[20].mxu1 %vm406_vm0, %v3294_v18  ;;  %2566 = vmatmul.mubr.msk.f32.gmra.mrb[22].mxu0 %vm406_vm0, %v3314_v5 }
 0x126   : > { %2439 = vmatprep.mubr.msk.f32.mxu1 %vm406_vm0, %v3317_v26  ;;  %2574 = vmatprep.mubr.msk.f32.mxu0 %vm406_vm0, %v3090_v50 }
 0x129   : > { %2440 = vmatmul.mubr.msk.f32.gmra.mrb[22].mxu1 %vm406_vm0, %v3314_v5  ;;  %2575 = vmatmul.mubr.msk.f32.vlgmr.msra.gmra.mrb[0].mxu0 %vm406_vm0, %v3109_v59 }
 0x12a   : > { %2448 = vmatprep.mubr.f32.mxu1 %v3098_v54  ;;  %2577 = vmatprep.mubr.msk.f32.mxu0 %vm406_vm0, %v3087_v49  ;;  %v234_v49 = vld [vmem:[%s3515_s30 + $0x8] sm:$0xff] }
 0x12d   : > { %2449 = vmatmul.mubr.f32.vlgmr.msra.gmra.mrb[0].mxu1 %v3119_v1  ;;  %2578 = vmatmul.mubr.msk.f32.gmra.mrb[2].mxu0 %vm406_vm0, %v3106_v58  ;;  %v233_v58 = vld [vmem:[%s3515_s30] sm:$0xff] }
 0x12e   : > { %2451 = vmatprep.mubr.f32.mxu1 %v3096_v53  ;;  %2580 = vmatprep.mubr.msk.f32.mxu0 %vm406_vm0, %v3130_v7 }
 0x131   : > { %2452 = vmatmul.mubr.f32.gmra.mrb[2].mxu1 %v3117_v0  ;;  %2581 = vmatmul.mubr.msk.f32.gmra.mrb[4].mxu0 %vm406_vm0, %v3127_v6 }
 0x132   : > { %2454 = vmatprep.mubr.f32.mxu1 %v3141_v17  ;;  %2583 = vmatprep.mubr.msk.f32.mxu0 %vm406_vm0, %v3152_v24 }
 0x135   : > { %2455 = vmatmul.mubr.f32.gmra.mrb[4].mxu1 %v3139_v16  ;;  %2584 = vmatmul.mubr.msk.f32.gmra.mrb[6].mxu0 %vm406_vm0, %v3149_v23  ;;  %v236_v16 = vld [vmem:[%s3515_s30 + $0x18] sm:$0xff] }
 0x136   : > { %2457 = vmatprep.mubr.f32.mxu1 %v3163_v33  ;;  %2586 = vmatprep.mubr.msk.f32.mxu0 %vm406_vm0, %v3174_v40 }
 0x139   : > { %2458 = vmatmul.mubr.f32.gmra.mrb[6].mxu1 %v3161_v32  ;;  %2587 = vmatmul.mubr.msk.f32.gmra.mrb[8].mxu0 %vm406_vm0, %v3171_v39  ;;  %v235_v32 = vld [vmem:[%s3515_s30 + $0x10] sm:$0xff] }
 0x13a   : > { %2460 = vmatprep.mubr.f32.mxu1 %v3185_v52  ;;  %2589 = vmatprep.mubr.msk.f32.mxu0 %vm406_vm0, %v3195_v63 }
 0x13d   : > { %2461 = vmatmul.mubr.f32.gmra.mrb[8].mxu1 %v3183_v51  ;;  %2590 = vmatmul.mubr.msk.f32.gmra.mrb[10].mxu0 %vm406_vm0, %v3192_v57  ;;  %v238_v57 = vld [vmem:[%s3515_s30 + $0x28] sm:$0xff] }
 0x13e   : > { %2463 = vmatprep.mubr.f32.mxu1 %v3207_v10  ;;  %2592 = vmatprep.mubr.msk.f32.mxu0 %vm406_vm0, %v3217_v21 }
 0x141   : > { %2464 = vmatmul.mubr.f32.gmra.mrb[10].mxu1 %v3205_v9  ;;  %2593 = vmatmul.mubr.msk.f32.gmra.mrb[12].mxu0 %vm406_vm0, %v3214_v20  ;;  %v237_v20 = vld [vmem:[%s3515_s30 + $0x20] sm:$0xff] }
 0x142   : > { %2466 = vmatprep.mubr.f32.mxu1 %v3227_v30  ;;  %2595 = vmatprep.mubr.msk.f32.mxu0 %vm406_vm0, %v3237_v43 }
 0x145   : > { %2467 = vmatmul.mubr.f32.gmra.mrb[12].mxu1 %v3225_v29  ;;  %2596 = vmatmul.mubr.msk.f32.gmra.mrb[14].mxu0 %vm406_vm0, %v3234_v41 }
 0x146   : > { %2469 = vmatprep.mubr.f32.mxu1 %v3247_v61  ;;  %2598 = vmatprep.mubr.msk.f32.mxu0 %vm406_vm0, %v3257_v11 }
 0x149   : > { %2470 = vmatmul.mubr.f32.gmra.mrb[14].mxu1 %v3245_v60  ;;  %2599 = vmatmul.mubr.msk.f32.gmra.mrb[16].mxu0 %vm406_vm0, %v3254_v8  ;;  %v240_v60 = vld [vmem:[%s3515_s30 + $0x38] sm:$0xff] }
 0x14a   : > { %2472 = vmatprep.mubr.f32.mxu1 %v3267_v27  ;;  %2601 = vmatprep.mubr.msk.f32.mxu0 %vm406_vm0, %v3277_v38 }
 0x14d   : > { %2473 = vmatmul.mubr.f32.gmra.mrb[16].mxu1 %v3265_v25  ;;  %2602 = vmatmul.mubr.msk.f32.gmra.mrb[18].mxu0 %vm406_vm0, %v3274_v37  ;;  %v239_v25 = vld [vmem:[%s3515_s30 + $0x30] sm:$0xff] }
 0x14e   : > { %2475 = vmatprep.mubr.f32.mxu1 %v3639_v14  ;;  %2604 = vmatprep.mubr.msk.f32.mxu0 %vm406_vm0, %v3297_v19  ;;  %v246_v14 = vld [vmem:[%s3515_s30 + $0x68] sm:$0xff] }
 0x151   : > { %2476 = vmatmul.mubr.f32.gmra.mrb[18].mxu1 %v3640_v15  ;;  %2605 = vmatmul.mubr.msk.f32.gmra.mrb[20].mxu0 %vm406_vm0, %v3294_v18  ;;  %v242_v18 = vld [vmem:[%s3515_s30 + $0x48] sm:$0xff] }
 0x152   : > { %2478 = vmatprep.mubr.f32.mxu1 %v3307_v31  ;;  %2607 = vmatprep.mubr.msk.f32.mxu0 %vm406_vm0, %v3317_v26 }
 0x155   : > { %2479 = vmatmul.mubr.f32.gmra.mrb[20].mxu1 %v3305_v36  ;;  %2608 = vmatmul.mubr.msk.f32.gmra.mrb[22].mxu0 %vm406_vm0, %v3314_v5  ;;  %v241_v5 = vld [vmem:[%s3515_s30 + $0x40] sm:$0xff] }
 0x156   : > { %2481 = vmatprep.mubr.f32.mxu1 %v3327_v22  ;;  %v244_v22 = vld [vmem:[%s3515_s30 + $0x58] sm:$0xff] }
 0x159   : > { %2482 = vmatmul.mubr.f32.gmra.mrb[22].mxu1 %v3325_v13 }
 0x1fc   : > { %v2576_v42 = vpop.f32.mrb[0].mxu0 }
 0x1fd   : > { %v1798_v47 = vpop.f32.mrb[1].mxu0 }
 0x200   : > { %v2450_v50 = vpop.f32.mrb[0].mxu1  ;;  %v2579_v53 = vpop.f32.mrb[2].mxu0 }
 0x201   : > { %v2634_v54 = vadd.f32 %v2576_v42, %v2450_v50  ;;  %v1085_v59 = vpop.f32.mrb[1].mxu1  ;;  %v1810_v0 = vpop.f32.mrb[3].mxu0 }
 0x202   : > { %v2635_v1 = vadd.f32 %v1798_v47, %v1085_v59 }
 0x203   : > { %v1941_v6 = vadd.f32 %v2634_v54, %v234_v49  ;;  %v245_v49 = vld [vmem:[%s3515_s30 + $0x60] sm:$0xff] }
 0x204   : > { %v1940_v7 = vadd.f32 %v2635_v1, %v233_v58  ;;  %v2453_v17 = vpop.f32.mrb[2].mxu1  ;;  %v2582_v23 = vpop.f32.mrb[4].mxu0 }
 0x205   : > { %1965 = vst [vmem:[%s3522_s5 + $0x8] sm:$0xff] %v1941_v6  ;;  %v2636_v24 = vadd.f32 %v2579_v53, %v2453_v17  ;;  %v1099_v33 = vpop.f32.mrb[3].mxu1  ;;  %v1822_v39 = vpop.f32.mrb[5].mxu0 }
 0x206   : > { %1964 = vst [vmem:[%s3522_s5] sm:$0xff] %v1940_v7  ;;  %v2637_v40 = vadd.f32 %v1810_v0, %v1099_v33  ;;  %v248_v0 = vld [vmem:[%s3515_s30 + $0x78] sm:$0xff] }
 0x207   : > { %v1943_v51 = vadd.f32 %v2636_v24, %v236_v16  ;;  %v247_v16 = vld [vmem:[%s3515_s30 + $0x70] sm:$0xff] }
 0x208   : > { %v1942_v52 = vadd.f32 %v2637_v40, %v235_v32  ;;  %v2456_v63 = vpop.f32.mrb[4].mxu1  ;;  %v2585_v9 = vpop.f32.mrb[6].mxu0 }
 0x209   : > { %1967 = vst [vmem:[%s3522_s5 + $0x18] sm:$0xff] %v1943_v51  ;;  %v2638_v10 = vadd.f32 %v2582_v23, %v2456_v63  ;;  %v1113_v21 = vpop.f32.mrb[5].mxu1  ;;  %v1834_v29 = vpop.f32.mrb[7].mxu0 }
 0x20a   : > { %1966 = vst [vmem:[%s3522_s5 + $0x10] sm:$0xff] %v1942_v52  ;;  %v2639_v30 = vadd.f32 %v1822_v39, %v1113_v21  ;;  %v250_v39 = vld [vmem:[%s3515_s30 + $0x88] sm:$0xff] }
 0x20b   : > { %v1945_v41 = vadd.f32 %v2638_v10, %v238_v57  ;;  %v249_v57 = vld [vmem:[%s3515_s30 + $0x80] sm:$0xff] }
 0x20c   : > { %v1944_v43 = vadd.f32 %v2639_v30, %v237_v20  ;;  %v2459_v61 = vpop.f32.mrb[6].mxu1  ;;  %v2588_v8 = vpop.f32.mrb[8].mxu0 }
 0x20d   : > { %1969 = vst [vmem:[%s3522_s5 + $0x28] sm:$0xff] %v1945_v41  ;;  %v2640_v11 = vadd.f32 %v2585_v9, %v2459_v61  ;;  %v1127_v27 = vpop.f32.mrb[7].mxu1  ;;  %v1846_v37 = vpop.f32.mrb[9].mxu0 }
 0x20e   : > { %1968 = vst [vmem:[%s3522_s5 + $0x20] sm:$0xff] %v1944_v43  ;;  %v2641_v38 = vadd.f32 %v1834_v29, %v1127_v27  ;;  %v252_v29 = vld [vmem:[%s3515_s30 + $0x98] sm:$0xff] }
 0x20f   : > { %v1947_v62 = vadd.f32 %v2640_v11, %v240_v60  ;;  %v251_v60 = vld [vmem:[%s3515_s30 + $0x90] sm:$0xff] }
 0x210   : > { %v1946_v2 = vadd.f32 %v2641_v38, %v239_v25  ;;  %v2462_v19 = vpop.f32.mrb[8].mxu1  ;;  %v2591_v36 = vpop.f32.mrb[10].mxu0 }
 0x211   : > { %1971 = vst [vmem:[%s3522_s5 + $0x38] sm:$0xff] %v1947_v62  ;;  %v2642_v31 = vadd.f32 %v2588_v8, %v2462_v19  ;;  %v1141_v26 = vpop.f32.mrb[9].mxu1  ;;  %v1858_v12 = vpop.f32.mrb[11].mxu0 }
 0x212   : > { %1970 = vst [vmem:[%s3522_s5 + $0x30] sm:$0xff] %v1946_v2  ;;  %v2643_v56 = vadd.f32 %v1846_v37, %v1141_v26  ;;  %v254_v37 = vld [vmem:[%s3515_s30 + $0xa8] sm:$0xff] }
 0x213   : > { %v1949_v28 = vadd.f32 %v2642_v31, %v242_v18  ;;  %v253_v18 = vld [vmem:[%s3515_s30 + $0xa0] sm:$0xff] }
 0x214   : > { %v1948_v13 = vadd.f32 %v2643_v56, %v241_v5  ;;  %v2465_v48 = vpop.f32.mrb[10].mxu1  ;;  %v2594_v45 = vpop.f32.mrb[12].mxu0 }
 0x215   : > { %1973 = vst [vmem:[%s3522_s5 + $0x48] sm:$0xff] %v1949_v28  ;;  %v2644_v46 = vadd.f32 %v2591_v36, %v2465_v48  ;;  %v1155_v34 = vpop.f32.mrb[11].mxu1  ;;  %v1870_v3 = vpop.f32.mrb[13].mxu0 }
 0x216   : > { %1972 = vst [vmem:[%s3522_s5 + $0x40] sm:$0xff] %v1948_v13  ;;  %v2645_v35 = vadd.f32 %v1858_v12, %v1155_v34  ;;  %v256_v12 = vld [vmem:[%s3515_s30 + $0xb8] sm:$0xff]  ;;  %v255_v13 = vld [vmem:[%s3515_s30 + $0xb0] sm:$0xff] }
 0x217   : > { %v1951_v44 = vadd.f32 %v2644_v46, %v244_v22 }
 0x218   : > { %v1950_v4 = vadd.f32 %v2645_v35, %v243_v55  ;;  %v2468_v15 = vpop.f32.mrb[12].mxu1  ;;  %v2597_v42 = vpop.f32.mrb[14].mxu0 }
 0x219   : > { %1975 = vst [vmem:[%s3522_s5 + $0x58] sm:$0xff] %v1951_v44  ;;  %v2646_v47 = vadd.f32 %v2594_v45, %v2468_v15  ;;  %v1169_v50 = vpop.f32.mrb[13].mxu1  ;;  %v1882_v53 = vpop.f32.mrb[15].mxu0 }
 0x21a   : > { %1974 = vst [vmem:[%s3522_s5 + $0x50] sm:$0xff] %v1950_v4  ;;  %v2647_v54 = vadd.f32 %v1870_v3, %v1169_v50 }
 0x21b   : > { %v1953_v58 = vadd.f32 %v2646_v47, %v246_v14 }
 0x21c   : > { %v1952_v59 = vadd.f32 %v2647_v54, %v245_v49  ;;  %v2471_v1 = vpop.f32.mrb[14].mxu1  ;;  %v2600_v6 = vpop.f32.mrb[16].mxu0 }
 0x21d   : > { %1977 = vst [vmem:[%s3522_s5 + $0x68] sm:$0xff] %v1953_v58  ;;  %v2648_v7 = vadd.f32 %v2597_v42, %v2471_v1  ;;  %v1183_v17 = vpop.f32.mrb[15].mxu1  ;;  %v1894_v23 = vpop.f32.mrb[17].mxu0 }
 0x21e   : > { %1976 = vst [vmem:[%s3522_s5 + $0x60] sm:$0xff] %v1952_v59  ;;  %v2649_v24 = vadd.f32 %v1882_v53, %v1183_v17 }
 0x21f   : > { %v1955_v32 = vadd.f32 %v2648_v7, %v248_v0 }
 0x220   : > { %v1954_v33 = vadd.f32 %v2649_v24, %v247_v16  ;;  %v2474_v40 = vpop.f32.mrb[16].mxu1  ;;  %v2603_v51 = vpop.f32.mrb[18].mxu0 }
 0x221   : > { %1979 = vst [vmem:[%s3522_s5 + $0x78] sm:$0xff] %v1955_v32  ;;  %v2650_v52 = vadd.f32 %v2600_v6, %v2474_v40  ;;  %v1197_v63 = vpop.f32.mrb[17].mxu1  ;;  %v1906_v9 = vpop.f32.mrb[19].mxu0 }
 0x222   : > { %1978 = vst [vmem:[%s3522_s5 + $0x70] sm:$0xff] %v1954_v33  ;;  %v2651_v10 = vadd.f32 %v1894_v23, %v1197_v63 }
 0x223   : > { %v1957_v20 = vadd.f32 %v2650_v52, %v250_v39 }
 0x224   : > { %v1956_v21 = vadd.f32 %v2651_v10, %v249_v57  ;;  %v2477_v30 = vpop.f32.mrb[18].mxu1  ;;  %v2606_v41 = vpop.f32.mrb[20].mxu0 }
 0x225   : > { %1981 = vst [vmem:[%s3522_s5 + $0x88] sm:$0xff] %v1957_v20  ;;  %v2652_v43 = vadd.f32 %v2603_v51, %v2477_v30  ;;  %v1211_v61 = vpop.f32.mrb[19].mxu1  ;;  %v1918_v8 = vpop.f32.mrb[21].mxu0 }
 0x226   : > { %1980 = vst [vmem:[%s3522_s5 + $0x80] sm:$0xff] %v1956_v21  ;;  %v2653_v11 = vadd.f32 %v1906_v9, %v1211_v61 }
 0x227   : > { %v1959_v25 = vadd.f32 %v2652_v43, %v252_v29 }
 0x228   : > { %v1958_v27 = vadd.f32 %v2653_v11, %v251_v60  ;;  %v2480_v38 = vpop.f32.mrb[20].mxu1  ;;  %v2609_v62 = vpop.f32.mrb[22].mxu0 }
 0x229   : > { %1983 = vst [vmem:[%s3522_s5 + $0x98] sm:$0xff] %v1959_v25  ;;  %v2654_v2 = vadd.f32 %v2606_v41, %v2480_v38  ;;  %v1225_v19 = vpop.f32.mrb[21].mxu1  ;;  %v1930_v36 = vpop.f32.mrb[23].mxu0 }
 0x22a   : > { %1982 = vst [vmem:[%s3522_s5 + $0x90] sm:$0xff] %v1958_v27  ;;  %v2655_v31 = vadd.f32 %v1918_v8, %v1225_v19 }
 0x22b   : > { %v1961_v5 = vadd.f32 %v2654_v2, %v254_v37 }
 0x22c   : > { %v1960_v26 = vadd.f32 %v2655_v31, %v253_v18  ;;  %v2483_v56 = vpop.f32.mrb[22].mxu1 }
 0x22d   : > { %1985 = vst [vmem:[%s3522_s5 + $0xa8] sm:$0xff] %v1961_v5  ;;  %v2656_v28 = vadd.f32 %v2609_v62, %v2483_v56  ;;  %v1239_v22 = vpop.f32.mrb[23].mxu1 }
 0x22e   : > { %1984 = vst [vmem:[%s3522_s5 + $0xa0] sm:$0xff] %v1960_v26  ;;  %v2657_v48 = vadd.f32 %v1930_v36, %v1239_v22 }
 0x22f   : > { %v1963_v45 = vadd.f32 %v2656_v28, %v256_v12 }
 0x230   : > { %v1962_v46 = vadd.f32 %v2657_v48, %v255_v13 }
 0x231   : > { %1987 = vst [vmem:[%s3522_s5 + $0xb8] sm:$0xff] %v1963_v45 }
 0x232   : > { %1986 = vst [vmem:[%s3522_s5 + $0xb0] sm:$0xff] %v1962_v46 }
 0x233   : > { %2854 = shalt.err (!%p2851_p7)
}
 0x234   : > { %s2855_s24 = scalar_lea.hbm %s3572_s10, 3072  ;;  %s2859_s27 = scalar_lea.hbm %s3624_s3, 6144 }
 0x235   : > { %p2856_p8 = scmp.ne.s32.totalorder %s3572_s10, %s2855_s24  ;;  %p2860_p1 = scmp.lt.u32.totalorder %s3572_s10, %s3624_s3 }
 0x236   : > { %p2861_p0 = scmp.lt.u32.totalorder %s2859_s27, %s2855_s24  ;;  %p2863_p6 = scmp.lt.u32.totalorder %s2855_s24, %s3572_s10 }
 0x237   : > { %p2857_p11 = pnand %p2856_p8, %p3641_p9 }
 0x238   : > { %p2862_p5 = por %p2861_p0, %p2860_p1 }
 0x239   : > { %p2858_p13 = pneg %p2857_p11 }
 0x23a   : > { %p2864_p10 = por %p2863_p6, %p2862_p5 }
 0x23c   : > { %p2865_p12 = pnand %p2864_p10, %p2858_p13 }
 0x23e   : > { %2868 = shalt.err (!%p2865_p12)
}
 0x23f   : > { %s2915_s30 = smov 128   ;;  %s2916_s4 = smov 8  }
 0x240   : > { %2759 = dma.vmem_to_hbm [thread:$0]  (%p3641_p9), %s3574_s7, 3072, %s3572_s10, %s3580_s16, %s2915_s30, %s2915_s30, %s2916_s4  }
 0x241 PF: > { %p2771_p2 = scmp.ge.s32.totalorder %s2907_s15, 2  ;;  %s2017_s5 = sand.u32 1, %s2895_s12  }
 0x242   : > { %p3642_p3 = scmp.ne.s32.totalorder %s3631_s23, 0  ;;  %s2018_s6 = scalar_lea.sflag [#allocation4], %s2017_s5 }
 0x244   : > { %p2766_p4 = pnand %p2771_p2, %p3642_p3 }
 0x246   : > { %2890 = dma.done.wait (!%p2766_p4), %s2018_s6, 3072  }
 0x247   : > { %2892 = vsyncadd (!%p2766_p4), %s2018_s6, 4294964224  ;;  %p14_p7 = scmp.ge.s32.totalorder %s2962_s18, 4   ;;  %s3643_s12 = smov %s2899_s13 }
 0x248   : > { %s3644_s13 = smov %s2903_s14  ;;  %s3645_s14 = smov %s2973_s21 }
 0x249   : > { %s3646_s15 = smov %s2962_s18  ;;  %16 = sbr.rel (!%p14_p7) target bundleno = 4 (0x4), region = 75 }
 0x250   :  { %2023 = vsyncpa [#allocation3], 1 }
 0x251   :  { %2025 = vsyncpa [#allocation3 + $0x1], 1 }
 0x252   :  { %2026 = vsyncpa [#allocation4], 1 }
 0x253   :  { %2028 = vsyncpa [#allocation4 + $0x1], 1 }

</bundles_post_ra>
